<compile_context>
chip_gen: v5e
topology: v5e:2x2
jax: 0.10.0
libtpu: 0.0.40
codegen_flags: <defaults>
</compile_context>

<pallas_src>
import functools

import jax
import jax.numpy as jnp
from jax import lax
from jax.experimental import pallas as pl
from jax.experimental.pallas import tpu as pltpu


def _round_up(x, m):
    return ((x + m - 1) // m) * m


def textrnn_kernel(gxf_ref, gxb_ref, whh_ref, bf_ref, bb_ref, wfc_ref, bfc_ref,
                   out_ref, h_ref, c_ref, *, seq_len, mask_time, unroll):
    """One (batch tile, time tile) grid step of the bidirectional TextRNN.

    gxf_ref : (T_TILE, TILE_B, G4) time-major forward pre-gates (x @ W_ih_f)
    gxb_ref : (TILE_B, G4)         pre-gates of the LAST token for the
                                   backward direction (x_{T-1} @ W_ih_b)
    whh_ref : (H, G4)              forward hidden-to-hidden weights
    bf/bb   : (1, G4) f32          combined biases (b_ih + b_hh)
    wfc_ref : (2H, LP), bfc_ref : (1, LP)
    out_ref : (TILE_B, LP)         logits (resident across the time axis)
    h_ref/c_ref : (TILE_B, H) f32 VMEM scratch carrying the recurrence.
    """
    t_blk = pl.program_id(1)
    n_t = pl.num_programs(1)
    t_tile = gxf_ref.shape[0]
    H = h_ref.shape[1]

    @pl.when(t_blk == 0)
    def _():
        h_ref[...] = jnp.zeros_like(h_ref)
        c_ref[...] = jnp.zeros_like(c_ref)

    w_hh = whh_ref[...]          # (H, G4), possibly bf16
    b_f = bf_ref[...]            # (1, G4), f32

    def step(t, carry):
        h, c = carry
        # Single dependent MXU op per step; x @ W_ih was folded in the wrapper.
        gates = (gxf_ref[t].astype(jnp.float32)
                 + jnp.dot(h.astype(w_hh.dtype), w_hh,
                           preferred_element_type=jnp.float32)
                 + b_f)
        i = jax.nn.sigmoid(gates[:, 0 * H:1 * H])
        f = jax.nn.sigmoid(gates[:, 1 * H:2 * H])
        g = jnp.tanh(gates[:, 2 * H:3 * H])
        o = jax.nn.sigmoid(gates[:, 3 * H:4 * H])
        c2 = f * c + i * g
        h2 = o * jnp.tanh(c2)
        if mask_time:
            valid = (t_blk * t_tile + t) < seq_len
            h2 = jnp.where(valid, h2, h)
            c2 = jnp.where(valid, c2, c)
        return h2, c2

    h, c = lax.fori_loop(0, t_tile, step, (h_ref[...], c_ref[...]),
                         unroll=unroll)
    h_ref[...] = h
    c_ref[...] = c

    @pl.when(t_blk == n_t - 1)
    def _():
        # Backward direction's output at the LAST position is its first
        # reverse-time step from zero state: h0 = 0 => no W_hh_b term,
        # f * c0 = 0, so only the i, g, o gates matter.
        gb = gxb_ref[...].astype(jnp.float32) + bb_ref[...]
        i_b = jax.nn.sigmoid(gb[:, 0 * H:1 * H])
        g_b = jnp.tanh(gb[:, 2 * H:3 * H])
        o_b = jax.nn.sigmoid(gb[:, 3 * H:4 * H])
        h_bwd = o_b * jnp.tanh(i_b * g_b)

        h_fwd = h_ref[...]
        # fc on concat(h_fwd, h_bwd): two static-ref-slice dots, no concat.
        out_ref[...] = (
            jnp.dot(h_fwd.astype(wfc_ref.dtype), wfc_ref[0:H, :],
                    preferred_element_type=jnp.float32)
            + jnp.dot(h_bwd.astype(wfc_ref.dtype), wfc_ref[H:2 * H, :],
                      preferred_element_type=jnp.float32)
            + bfc_ref[...])


def _vmem_limit_bytes():
    cap = 128 * 1024 * 1024
    try:
        info = pltpu.get_tpu_info()
        cap = int(getattr(info, "vmem_capacity_bytes", cap))
    except Exception:
        pass
    # ~55 MiB budget on v7x (64 MiB physical), ~108 MiB on v5e/v6e (128 MiB).
    return int(min(cap * 0.85, 112 * 1024 * 1024))


def _tile_plan(B, T, G4, LP, H, gx_bytes, vmem_budget):
    """Pick (TILE_B, T_TILE): large batch tile (target 128) while keeping >= 2
    batch grid steps when possible (v7x), pre-gate stream tiled along T so the
    double-buffered working set fits the VMEM budget."""
    b_pad8 = _round_up(max(B, 1), 8)
    tile_b = max(8, min(128, _round_up(-(-b_pad8 // 2), 8)))
    t_tile = max(1, min(T, 32))

    def vmem_use(tb, tt):
        dbl = 2  # BlockSpec double buffering
        gx_f = dbl * tt * tb * G4 * gx_bytes
        gx_b = dbl * tb * G4 * gx_bytes
        wts = dbl * (H * G4 * gx_bytes + 2 * H * LP * gx_bytes
                     + 2 * G4 * 4 + LP * 4)
        out = dbl * tb * LP * 4
        scratch = 2 * tb * H * 4
        return gx_f + gx_b + wts + out + scratch

    while t_tile > 1 and vmem_use(tile_b, t_tile) > vmem_budget:
        t_tile = max(1, t_tile // 2)
    while tile_b > 8 and vmem_use(tile_b, t_tile) > vmem_budget:
        tile_b = max(8, tile_b - 8)
    return tile_b, t_tile


def text_rnn_forward(x_ids, params, *, mxu_dtype=jnp.bfloat16):
    """x_ids: (B, T) int32 token ids -> (B, label_num) logits."""
    table = params["embedding"].astype(jnp.float32)          # (V, E)
    E = table.shape[1]
    H = params["whh_f"].shape[0]
    L = params["wfc"].shape[1]
    B, T = x_ids.shape

    # Gate layout: gate g occupies columns [g*H, (g+1)*H); only the combined
    # 4H is padded up to a lane multiple (free when H % 128 == 0, and no 16x
    # matmul inflation when H < 128).
    G4 = _round_up(4 * H, 128)
    LP = _round_up(L, 128)

    def pad_cols(w, width):
        w = w.astype(jnp.float32)
        return jnp.zeros((w.shape[0], width), jnp.float32).at[:, :w.shape[1]].set(w)

    wih_f = pad_cols(params["wih_f"], G4)                     # (E, G4)
    wih_b = pad_cols(params["wih_b"], G4)                     # (E, G4)
    b_f = pad_cols(params["b_f"], G4)                         # (1, G4)  f32
    b_b = pad_cols(params["b_b"], G4)                         # (1, G4)  f32
    whh_f = pad_cols(params["whh_f"], G4).astype(mxu_dtype)   # (H, G4)
    wfc = pad_cols(params["wfc"], LP).astype(mxu_dtype)       # (2H, LP)
    bfc = pad_cols(params["bfc"], LP)                         # (1, LP)  f32

    gx_bytes = 2 if mxu_dtype == jnp.bfloat16 else 4
    vmem_limit = _vmem_limit_bytes()
    TILE_B, T_TILE = _tile_plan(B, T, G4, LP, H, gx_bytes,
                                int(vmem_limit * 0.9))
    B_pad = _round_up(B, TILE_B)
    T_pad = _round_up(T, T_TILE)

    # Pre-gates gathered directly time-major and projected with one dense
    # (T*B, E) @ (E, 4H) matmul (no (V, 4H) table materialization, no big
    # transpose).  Backward direction only needs the last token (h0 = c0 = 0).
    emb_tm = jnp.take(table, x_ids.T, axis=0)                 # (T, B, E)
    gx_f = (emb_tm.reshape(T * B, E) @ wih_f).reshape(T, B, G4).astype(mxu_dtype)
    emb_last = jnp.take(table, x_ids[:, -1], axis=0)          # (B, E)
    gx_b = (emb_last @ wih_b).astype(mxu_dtype)               # (B, G4)

    if T_pad != T or B_pad != B:
        gx_f = jnp.pad(gx_f, ((0, T_pad - T), (0, B_pad - B), (0, 0)))
    if B_pad != B:
        gx_b = jnp.pad(gx_b, ((0, B_pad - B), (0, 0)))

    # Full unroll only for small tiles; large tiles use unroll=2 to keep vreg
    # live ranges (and instruction memory) bounded.
    unroll = 2 if TILE_B >= 64 else max(1, min(T_TILE, 8))

    kernel = functools.partial(textrnn_kernel, seq_len=T,
                               mask_time=(T_pad != T), unroll=unroll)

    grid = (B_pad // TILE_B, T_pad // T_TILE)

    out = pl.pallas_call(
        kernel,
        out_shape=jax.ShapeDtypeStruct((B_pad, LP), jnp.float32),
        grid=grid,
        in_specs=[
            pl.BlockSpec((T_TILE, TILE_B, G4), lambda b, t: (t, b, 0)),  # fwd pre-gates (streamed over T)
            pl.BlockSpec((TILE_B, G4), lambda b, t: (b, 0)),             # bwd last-token pre-gates
            pl.BlockSpec((H, G4), lambda b, t: (0, 0)),                  # W_hh fwd
            pl.BlockSpec((1, G4), lambda b, t: (0, 0)),                  # bias fwd
            pl.BlockSpec((1, G4), lambda b, t: (0, 0)),                  # bias bwd
            pl.BlockSpec((2 * H, LP), lambda b, t: (0, 0)),              # fc weight
            pl.BlockSpec((1, LP), lambda b, t: (0, 0)),                  # fc bias
        ],
        out_specs=pl.BlockSpec((TILE_B, LP), lambda b, t: (b, 0)),
        scratch_shapes=[pltpu.VMEM((TILE_B, H), jnp.float32),   # h carry
                        pltpu.VMEM((TILE_B, H), jnp.float32)],  # c carry
        compiler_params=pltpu.CompilerParams(
            dimension_semantics=("parallel", "arbitrary"),
            vmem_limit_bytes=vmem_limit,
        ),
    )(gx_f, gx_b, whh_f, b_f, b_b, wfc, bfc)

    return out[:B, :L]


def init_params(key, vocab_size, embedding_dim, hidden_size, label_num):
    E, H, L = embedding_dim, hidden_size, label_num
    ks = jax.random.split(key, 10)
    s = 0.1
    n = lambda k, shape: s * jax.random.normal(k, shape, jnp.float32)
    return {
        "embedding": n(ks[0], (vocab_size, E)),
        # forward direction (b = b_ih + b_hh combined, PyTorch-equivalent)
        "wih_f": n(ks[1], (E, 4 * H)),
        "whh_f": n(ks[2], (H, 4 * H)),
        "b_f":   n(ks[3], (1, 4 * H)),
        # backward direction (whh_b kept for fidelity; unused since h0 = 0)
        "wih_b": n(ks[4], (E, 4 * H)),
        "whh_b": n(ks[5], (H, 4 * H)),
        "b_b":   n(ks[6], (1, 4 * H)),
        # fc (weight pre-transposed to (2H, L))
        "wfc":   n(ks[7], (2 * H, L)),
        "bfc":   n(ks[8], (1, L)),
    }


def ref_forward(x_ids, p):
    """Pure-JAX reference (same math, unpadded) for correctness."""
    emb = jnp.take(p["embedding"], x_ids, axis=0).astype(jnp.float32)
    B, T, _ = emb.shape
    H = p["whh_f"].shape[0]

    def cell(xt, h, c, wih, whh, b):
        g = xt @ wih + h @ whh + b
        i = jax.nn.sigmoid(g[:, :H])
        f = jax.nn.sigmoid(g[:, H:2 * H])
        gg = jnp.tanh(g[:, 2 * H:3 * H])
        o = jax.nn.sigmoid(g[:, 3 * H:])
        c2 = f * c + i * gg
        return o * jnp.tanh(c2), c2

    h = jnp.zeros((B, H), jnp.float32)
    c = jnp.zeros((B, H), jnp.float32)
    for t in range(T):
        h, c = cell(emb[:, t, :], h, c, p["wih_f"], p["whh_f"], p["b_f"])
    hb, _ = cell(emb[:, T - 1, :], jnp.zeros((B, H)), jnp.zeros((B, H)),
                 p["wih_b"], p["whh_b"], p["b_b"])
    return jnp.concatenate([h, hb], axis=-1) @ p["wfc"] + p["bfc"]


if __name__ == "__main__":
    vocab_size = 50
    embedding_dim = 16
    hidden_size = 32
    label_num = 4          # kernel implements layer_num=1, bidirectional=True
    B, T = 2, 8

    key = jax.random.PRNGKey(0)
    k_param, k_data, k_data2 = jax.random.split(key, 3)
    params = init_params(k_param, vocab_size, embedding_dim, hidden_size,
                         label_num)
    x_ids = jax.random.randint(k_data, (B, T), 0, vocab_size, dtype=jnp.int32)

    ref = jax.block_until_ready(ref_forward(x_ids, params))

    # Exact-dtype path (f32 MXU operands).
    out_f32 = jax.block_until_ready(
        text_rnn_forward(x_ids, params, mxu_dtype=jnp.float32))
    assert out_f32.shape == (B, label_num)
    assert jnp.allclose(out_f32, ref, atol=1e-4, rtol=1e-4), (out_f32, ref)

    # Production path (bf16 pre-gate stream / MXU operands, f32 carry+gates).
    out_bf16 = jax.block_until_ready(
        text_rnn_forward(x_ids, params, mxu_dtype=jnp.bfloat16))
    assert out_bf16.shape == (B, label_num)
    assert jnp.allclose(out_bf16, ref, atol=2e-2, rtol=2e-2), (out_bf16, ref)

    # Larger config exercising batch tiling, time tiling and the tail-of-T mask.
    B2, T2 = 20, 40
    x_ids2 = jax.random.randint(k_data2, (B2, T2), 0, vocab_size,
                                dtype=jnp.int32)
    ref2 = jax.block_until_ready(ref_forward(x_ids2, params))
    out2 = jax.block_until_ready(
        text_rnn_forward(x_ids2, params, mxu_dtype=jnp.float32))
    assert out2.shape == (B2, label_num)
    assert jnp.allclose(out2, ref2, atol=5e-4, rtol=5e-4), (out2, ref2)

    print("KERNEL_OK")
</pallas_src>

<mosaic_0001>
module attributes {stable_mosaic.version = 11 : i64} {
  func.func @textrnn_kernel(%arg0: i32, %arg1: i32, %arg2: memref<8x8x128xf32, #tpu.memory_space<vmem>>, %arg3: memref<8x128xf32, #tpu.memory_space<vmem>>, %arg4: memref<32x128xf32, #tpu.memory_space<vmem>>, %arg5: memref<1x128xf32, #tpu.memory_space<vmem>>, %arg6: memref<1x128xf32, #tpu.memory_space<vmem>>, %arg7: memref<64x128xf32, #tpu.memory_space<vmem>>, %arg8: memref<1x128xf32, #tpu.memory_space<vmem>>, %arg9: memref<8x128xf32, #tpu.memory_space<vmem>>, %arg10: memref<8x32xf32, #tpu.memory_space<vmem>>, %arg11: memref<8x32xf32, #tpu.memory_space<vmem>>) attributes {dimension_semantics = [#tpu.dimension_semantics<parallel>, #tpu.dimension_semantics<arbitrary>], iteration_bounds = array<i64: 1, 1>, scalar_prefetch = 0 : i64, scratch_operands = 2 : i64, tpu.core_type = #tpu.core_type<tc>, window_params = [{transform_indices = @transform_0, window_bounds = array<i64: 8, 8, 128>}, {transform_indices = @transform_1, window_bounds = array<i64: 8, 128>}, {pipeline_mode = #tpu.pipeline_mode<synchronous>, transform_indices = @transform_2, window_bounds = array<i64: 32, 128>}, {pipeline_mode = #tpu.pipeline_mode<synchronous>, transform_indices = @transform_3, window_bounds = array<i64: 1, 128>}, {pipeline_mode = #tpu.pipeline_mode<synchronous>, transform_indices = @transform_4, window_bounds = array<i64: 1, 128>}, {pipeline_mode = #tpu.pipeline_mode<synchronous>, transform_indices = @transform_5, window_bounds = array<i64: 64, 128>}, {pipeline_mode = #tpu.pipeline_mode<synchronous>, transform_indices = @transform_6, window_bounds = array<i64: 1, 128>}, {transform_indices = @transform_7, window_bounds = array<i64: 8, 128>}]} {
    %c0_i32 = arith.constant 0 : i32
    %0 = arith.cmpi eq, %arg1, %c0_i32 : i32
    %1 = arith.extui %0 : i1 to i32
    %c0_i32_0 = arith.constant 0 : i32
    %2 = arith.cmpi ne, %1, %c0_i32_0 : i32
    scf.if %2 {
      %cst_62 = arith.constant 0.000000e+00 : f32
      %268 = vector.broadcast %cst_62 : f32 to vector<8x32xf32>
      %c0_63 = arith.constant 0 : index
      %c0_64 = arith.constant 0 : index
      %269 = vector.load %arg10[%c0_63, %c0_64] : memref<8x32xf32, #tpu.memory_space<vmem>>, vector<8x32xf32>
      tpu.vector_store %arg10[%c0_63, %c0_64], %268 {strides = array<i32>} : memref<8x32xf32, #tpu.memory_space<vmem>>, vector<8x32xf32>,
      %cst_65 = arith.constant 0.000000e+00 : f32
      %270 = vector.broadcast %cst_65 : f32 to vector<8x32xf32>
      %c0_66 = arith.constant 0 : index
      %c0_67 = arith.constant 0 : index
      %271 = vector.load %arg11[%c0_66, %c0_67] : memref<8x32xf32, #tpu.memory_space<vmem>>, vector<8x32xf32>
      tpu.vector_store %arg11[%c0_66, %c0_67], %270 {strides = array<i32>} : memref<8x32xf32, #tpu.memory_space<vmem>>, vector<8x32xf32>,
    } else {
    }
    %c0 = arith.constant 0 : index
    %c0_1 = arith.constant 0 : index
    %3 = vector.load %arg4[%c0, %c0_1] : memref<32x128xf32, #tpu.memory_space<vmem>>, vector<32x128xf32>
    %c0_2 = arith.constant 0 : index
    %c0_3 = arith.constant 0 : index
    %4 = vector.load %arg5[%c0_2, %c0_3] : memref<1x128xf32, #tpu.memory_space<vmem>>, vector<1x128xf32>
    %c0_4 = arith.constant 0 : index
    %c0_5 = arith.constant 0 : index
    %5 = vector.load %arg10[%c0_4, %c0_5] : memref<8x32xf32, #tpu.memory_space<vmem>>, vector<8x32xf32>
    %c0_6 = arith.constant 0 : index
    %c0_7 = arith.constant 0 : index
    %6 = vector.load %arg11[%c0_6, %c0_7] : memref<8x32xf32, #tpu.memory_space<vmem>>, vector<8x32xf32>
    %c0_i32_8 = arith.constant 0 : i32
    %7 = arith.index_cast %c0_i32_8 : i32 to index
    %c0_9 = arith.constant 0 : index
    %c0_10 = arith.constant 0 : index
    %8 = vector.load %arg2[%7, %c0_9, %c0_10] : memref<8x8x128xf32, #tpu.memory_space<vmem>>, vector<1x8x128xf32>
    %9 = vector.shape_cast %8 : vector<1x8x128xf32> to vector<8x128xf32>
    %cst = arith.constant dense<0.000000e+00> : vector<8x128xf32>
    %10 = tpu.matmul %5, %3, %cst {dimension_numbers = #tpu.dot_dimension_numbers<[1], [0], [0], [1], [0, 0, 1, 1], [], []>} : vector<8x32xf32>, vector<32x128xf32>, vector<8x128xf32> -> vector<8x128xf32>
    %11 = arith.addf %9, %10 : vector<8x128xf32>
    %12 = vector.broadcast %4 : vector<1x128xf32> to vector<8x128xf32>
    %13 = arith.addf %11, %12 : vector<8x128xf32>
    %14 = vector.extract_strided_slice %13 {offsets = [0, 0], sizes = [8, 32], strides = [1, 1]} : vector<8x128xf32> to vector<8x32xf32>
    %15 = arith.negf %14 : vector<8x32xf32>
    %16 = math.exp %15 : vector<8x32xf32>
    %cst_11 = arith.constant 1.000000e+00 : f32
    %17 = vector.broadcast %cst_11 : f32 to vector<8x32xf32>
    %18 = arith.addf %17, %16 : vector<8x32xf32>
    %19 = arith.divf %17, %18 : vector<8x32xf32>
    %20 = vector.extract_strided_slice %13 {offsets = [0, 32], sizes = [8, 32], strides = [1, 1]} : vector<8x128xf32> to vector<8x32xf32>
    %21 = arith.negf %20 : vector<8x32xf32>
    %22 = math.exp %21 : vector<8x32xf32>
    %cst_12 = arith.constant 1.000000e+00 : f32
    %23 = vector.broadcast %cst_12 : f32 to vector<8x32xf32>
    %24 = arith.addf %23, %22 : vector<8x32xf32>
    %25 = arith.divf %23, %24 : vector<8x32xf32>
    %26 = vector.extract_strided_slice %13 {offsets = [0, 64], sizes = [8, 32], strides = [1, 1]} : vector<8x128xf32> to vector<8x32xf32>
    %27 = math.tanh %26 : vector<8x32xf32>
    %28 = vector.extract_strided_slice %13 {offsets = [0, 96], sizes = [8, 32], strides = [1, 1]} : vector<8x128xf32> to vector<8x32xf32>
    %29 = arith.negf %28 : vector<8x32xf32>
    %30 = math.exp %29 : vector<8x32xf32>
    %cst_13 = arith.constant 1.000000e+00 : f32
    %31 = vector.broadcast %cst_13 : f32 to vector<8x32xf32>
    %32 = arith.addf %31, %30 : vector<8x32xf32>
    %33 = arith.divf %31, %32 : vector<8x32xf32>
    %34 = arith.mulf %25, %6 : vector<8x32xf32>
    %35 = arith.mulf %19, %27 : vector<8x32xf32>
    %36 = arith.addf %34, %35 : vector<8x32xf32>
    %37 = math.tanh %36 : vector<8x32xf32>
    %38 = arith.mulf %33, %37 : vector<8x32xf32>
    %c1_i32 = arith.constant 1 : i32
    %39 = arith.index_cast %c1_i32 : i32 to index
    %c0_14 = arith.constant 0 : index
    %c0_15 = arith.constant 0 : index
    %40 = vector.load %arg2[%39, %c0_14, %c0_15] : memref<8x8x128xf32, #tpu.memory_space<vmem>>, vector<1x8x128xf32>
    %41 = vector.shape_cast %40 : vector<1x8x128xf32> to vector<8x128xf32>
    %cst_16 = arith.constant dense<0.000000e+00> : vector<8x128xf32>
    %42 = tpu.matmul %38, %3, %cst_16 {dimension_numbers = #tpu.dot_dimension_numbers<[1], [0], [0], [1], [0, 0, 1, 1], [], []>} : vector<8x32xf32>, vector<32x128xf32>, vector<8x128xf32> -> vector<8x128xf32>
    %43 = arith.addf %41, %42 : vector<8x128xf32>
    %44 = vector.broadcast %4 : vector<1x128xf32> to vector<8x128xf32>
    %45 = arith.addf %43, %44 : vector<8x128xf32>
    %46 = vector.extract_strided_slice %45 {offsets = [0, 0], sizes = [8, 32], strides = [1, 1]} : vector<8x128xf32> to vector<8x32xf32>
    %47 = arith.negf %46 : vector<8x32xf32>
    %48 = math.exp %47 : vector<8x32xf32>
    %cst_17 = arith.constant 1.000000e+00 : f32
    %49 = vector.broadcast %cst_17 : f32 to vector<8x32xf32>
    %50 = arith.addf %49, %48 : vector<8x32xf32>
    %51 = arith.divf %49, %50 : vector<8x32xf32>
    %52 = vector.extract_strided_slice %45 {offsets = [0, 32], sizes = [8, 32], strides = [1, 1]} : vector<8x128xf32> to vector<8x32xf32>
    %53 = arith.negf %52 : vector<8x32xf32>
    %54 = math.exp %53 : vector<8x32xf32>
    %cst_18 = arith.constant 1.000000e+00 : f32
    %55 = vector.broadcast %cst_18 : f32 to vector<8x32xf32>
    %56 = arith.addf %55, %54 : vector<8x32xf32>
    %57 = arith.divf %55, %56 : vector<8x32xf32>
    %58 = vector.extract_strided_slice %45 {offsets = [0, 64], sizes = [8, 32], strides = [1, 1]} : vector<8x128xf32> to vector<8x32xf32>
    %59 = math.tanh %58 : vector<8x32xf32>
    %60 = vector.extract_strided_slice %45 {offsets = [0, 96], sizes = [8, 32], strides = [1, 1]} : vector<8x128xf32> to vector<8x32xf32>
    %61 = arith.negf %60 : vector<8x32xf32>
    %62 = math.exp %61 : vector<8x32xf32>
    %cst_19 = arith.constant 1.000000e+00 : f32
    %63 = vector.broadcast %cst_19 : f32 to vector<8x32xf32>
    %64 = arith.addf %63, %62 : vector<8x32xf32>
    %65 = arith.divf %63, %64 : vector<8x32xf32>
    %66 = arith.mulf %57, %36 : vector<8x32xf32>
    %67 = arith.mulf %51, %59 : vector<8x32xf32>
    %68 = arith.addf %66, %67 : vector<8x32xf32>
    %69 = math.tanh %68 : vector<8x32xf32>
    %70 = arith.mulf %65, %69 : vector<8x32xf32>
    %c2_i32 = arith.constant 2 : i32
    %71 = arith.index_cast %c2_i32 : i32 to index
    %c0_20 = arith.constant 0 : index
    %c0_21 = arith.constant 0 : index
    %72 = vector.load %arg2[%71, %c0_20, %c0_21] : memref<8x8x128xf32, #tpu.memory_space<vmem>>, vector<1x8x128xf32>
    %73 = vector.shape_cast %72 : vector<1x8x128xf32> to vector<8x128xf32>
    %cst_22 = arith.constant dense<0.000000e+00> : vector<8x128xf32>
    %74 = tpu.matmul %70, %3, %cst_22 {dimension_numbers = #tpu.dot_dimension_numbers<[1], [0], [0], [1], [0, 0, 1, 1], [], []>} : vector<8x32xf32>, vector<32x128xf32>, vector<8x128xf32> -> vector<8x128xf32>
    %75 = arith.addf %73, %74 : vector<8x128xf32>
    %76 = vector.broadcast %4 : vector<1x128xf32> to vector<8x128xf32>
    %77 = arith.addf %75, %76 : vector<8x128xf32>
    %78 = vector.extract_strided_slice %77 {offsets = [0, 0], sizes = [8, 32], strides = [1, 1]} : vector<8x128xf32> to vector<8x32xf32>
    %79 = arith.negf %78 : vector<8x32xf32>
    %80 = math.exp %79 : vector<8x32xf32>
    %cst_23 = arith.constant 1.000000e+00 : f32
    %81 = vector.broadcast %cst_23 : f32 to vector<8x32xf32>
    %82 = arith.addf %81, %80 : vector<8x32xf32>
    %83 = arith.divf %81, %82 : vector<8x32xf32>
    %84 = vector.extract_strided_slice %77 {offsets = [0, 32], sizes = [8, 32], strides = [1, 1]} : vector<8x128xf32> to vector<8x32xf32>
    %85 = arith.negf %84 : vector<8x32xf32>
    %86 = math.exp %85 : vector<8x32xf32>
    %cst_24 = arith.constant 1.000000e+00 : f32
    %87 = vector.broadcast %cst_24 : f32 to vector<8x32xf32>
    %88 = arith.addf %87, %86 : vector<8x32xf32>
    %89 = arith.divf %87, %88 : vector<8x32xf32>
    %90 = vector.extract_strided_slice %77 {offsets = [0, 64], sizes = [8, 32], strides = [1, 1]} : vector<8x128xf32> to vector<8x32xf32>
    %91 = math.tanh %90 : vector<8x32xf32>
    %92 = vector.extract_strided_slice %77 {offsets = [0, 96], sizes = [8, 32], strides = [1, 1]} : vector<8x128xf32> to vector<8x32xf32>
    %93 = arith.negf %92 : vector<8x32xf32>
    %94 = math.exp %93 : vector<8x32xf32>
    %cst_25 = arith.constant 1.000000e+00 : f32
    %95 = vector.broadcast %cst_25 : f32 to vector<8x32xf32>
    %96 = arith.addf %95, %94 : vector<8x32xf32>
    %97 = arith.divf %95, %96 : vector<8x32xf32>
    %98 = arith.mulf %89, %68 : vector<8x32xf32>
    %99 = arith.mulf %83, %91 : vector<8x32xf32>
    %100 = arith.addf %98, %99 : vector<8x32xf32>
    %101 = math.tanh %100 : vector<8x32xf32>
    %102 = arith.mulf %97, %101 : vector<8x32xf32>
    %c3_i32 = arith.constant 3 : i32
    %103 = arith.index_cast %c3_i32 : i32 to index
    %c0_26 = arith.constant 0 : index
    %c0_27 = arith.constant 0 : index
    %104 = vector.load %arg2[%103, %c0_26, %c0_27] : memref<8x8x128xf32, #tpu.memory_space<vmem>>, vector<1x8x128xf32>
    %105 = vector.shape_cast %104 : vector<1x8x128xf32> to vector<8x128xf32>
    %cst_28 = arith.constant dense<0.000000e+00> : vector<8x128xf32>
    %106 = tpu.matmul %102, %3, %cst_28 {dimension_numbers = #tpu.dot_dimension_numbers<[1], [0], [0], [1], [0, 0, 1, 1], [], []>} : vector<8x32xf32>, vector<32x128xf32>, vector<8x128xf32> -> vector<8x128xf32>
    %107 = arith.addf %105, %106 : vector<8x128xf32>
    %108 = vector.broadcast %4 : vector<1x128xf32> to vector<8x128xf32>
    %109 = arith.addf %107, %108 : vector<8x128xf32>
    %110 = vector.extract_strided_slice %109 {offsets = [0, 0], sizes = [8, 32], strides = [1, 1]} : vector<8x128xf32> to vector<8x32xf32>
    %111 = arith.negf %110 : vector<8x32xf32>
    %112 = math.exp %111 : vector<8x32xf32>
    %cst_29 = arith.constant 1.000000e+00 : f32
    %113 = vector.broadcast %cst_29 : f32 to vector<8x32xf32>
    %114 = arith.addf %113, %112 : vector<8x32xf32>
    %115 = arith.divf %113, %114 : vector<8x32xf32>
    %116 = vector.extract_strided_slice %109 {offsets = [0, 32], sizes = [8, 32], strides = [1, 1]} : vector<8x128xf32> to vector<8x32xf32>
    %117 = arith.negf %116 : vector<8x32xf32>
    %118 = math.exp %117 : vector<8x32xf32>
    %cst_30 = arith.constant 1.000000e+00 : f32
    %119 = vector.broadcast %cst_30 : f32 to vector<8x32xf32>
    %120 = arith.addf %119, %118 : vector<8x32xf32>
    %121 = arith.divf %119, %120 : vector<8x32xf32>
    %122 = vector.extract_strided_slice %109 {offsets = [0, 64], sizes = [8, 32], strides = [1, 1]} : vector<8x128xf32> to vector<8x32xf32>
    %123 = math.tanh %122 : vector<8x32xf32>
    %124 = vector.extract_strided_slice %109 {offsets = [0, 96], sizes = [8, 32], strides = [1, 1]} : vector<8x128xf32> to vector<8x32xf32>
    %125 = arith.negf %124 : vector<8x32xf32>
    %126 = math.exp %125 : vector<8x32xf32>
    %cst_31 = arith.constant 1.000000e+00 : f32
    %127 = vector.broadcast %cst_31 : f32 to vector<8x32xf32>
    %128 = arith.addf %127, %126 : vector<8x32xf32>
    %129 = arith.divf %127, %128 : vector<8x32xf32>
    %130 = arith.mulf %121, %100 : vector<8x32xf32>
    %131 = arith.mulf %115, %123 : vector<8x32xf32>
    %132 = arith.addf %130, %131 : vector<8x32xf32>
    %133 = math.tanh %132 : vector<8x32xf32>
    %134 = arith.mulf %129, %133 : vector<8x32xf32>
    %c4_i32 = arith.constant 4 : i32
    %135 = arith.index_cast %c4_i32 : i32 to index
    %c0_32 = arith.constant 0 : index
    %c0_33 = arith.constant 0 : index
    %136 = vector.load %arg2[%135, %c0_32, %c0_33] : memref<8x8x128xf32, #tpu.memory_space<vmem>>, vector<1x8x128xf32>
    %137 = vector.shape_cast %136 : vector<1x8x128xf32> to vector<8x128xf32>
    %cst_34 = arith.constant dense<0.000000e+00> : vector<8x128xf32>
    %138 = tpu.matmul %134, %3, %cst_34 {dimension_numbers = #tpu.dot_dimension_numbers<[1], [0], [0], [1], [0, 0, 1, 1], [], []>} : vector<8x32xf32>, vector<32x128xf32>, vector<8x128xf32> -> vector<8x128xf32>
    %139 = arith.addf %137, %138 : vector<8x128xf32>
    %140 = vector.broadcast %4 : vector<1x128xf32> to vector<8x128xf32>
    %141 = arith.addf %139, %140 : vector<8x128xf32>
    %142 = vector.extract_strided_slice %141 {offsets = [0, 0], sizes = [8, 32], strides = [1, 1]} : vector<8x128xf32> to vector<8x32xf32>
    %143 = arith.negf %142 : vector<8x32xf32>
    %144 = math.exp %143 : vector<8x32xf32>
    %cst_35 = arith.constant 1.000000e+00 : f32
    %145 = vector.broadcast %cst_35 : f32 to vector<8x32xf32>
    %146 = arith.addf %145, %144 : vector<8x32xf32>
    %147 = arith.divf %145, %146 : vector<8x32xf32>
    %148 = vector.extract_strided_slice %141 {offsets = [0, 32], sizes = [8, 32], strides = [1, 1]} : vector<8x128xf32> to vector<8x32xf32>
    %149 = arith.negf %148 : vector<8x32xf32>
    %150 = math.exp %149 : vector<8x32xf32>
    %cst_36 = arith.constant 1.000000e+00 : f32
    %151 = vector.broadcast %cst_36 : f32 to vector<8x32xf32>
    %152 = arith.addf %151, %150 : vector<8x32xf32>
    %153 = arith.divf %151, %152 : vector<8x32xf32>
    %154 = vector.extract_strided_slice %141 {offsets = [0, 64], sizes = [8, 32], strides = [1, 1]} : vector<8x128xf32> to vector<8x32xf32>
    %155 = math.tanh %154 : vector<8x32xf32>
    %156 = vector.extract_strided_slice %141 {offsets = [0, 96], sizes = [8, 32], strides = [1, 1]} : vector<8x128xf32> to vector<8x32xf32>
    %157 = arith.negf %156 : vector<8x32xf32>
    %158 = math.exp %157 : vector<8x32xf32>
    %cst_37 = arith.constant 1.000000e+00 : f32
    %159 = vector.broadcast %cst_37 : f32 to vector<8x32xf32>
    %160 = arith.addf %159, %158 : vector<8x32xf32>
    %161 = arith.divf %159, %160 : vector<8x32xf32>
    %162 = arith.mulf %153, %132 : vector<8x32xf32>
    %163 = arith.mulf %147, %155 : vector<8x32xf32>
    %164 = arith.addf %162, %163 : vector<8x32xf32>
    %165 = math.tanh %164 : vector<8x32xf32>
    %166 = arith.mulf %161, %165 : vector<8x32xf32>
    %c5_i32 = arith.constant 5 : i32
    %167 = arith.index_cast %c5_i32 : i32 to index
    %c0_38 = arith.constant 0 : index
    %c0_39 = arith.constant 0 : index
    %168 = vector.load %arg2[%167, %c0_38, %c0_39] : memref<8x8x128xf32, #tpu.memory_space<vmem>>, vector<1x8x128xf32>
    %169 = vector.shape_cast %168 : vector<1x8x128xf32> to vector<8x128xf32>
    %cst_40 = arith.constant dense<0.000000e+00> : vector<8x128xf32>
    %170 = tpu.matmul %166, %3, %cst_40 {dimension_numbers = #tpu.dot_dimension_numbers<[1], [0], [0], [1], [0, 0, 1, 1], [], []>} : vector<8x32xf32>, vector<32x128xf32>, vector<8x128xf32> -> vector<8x128xf32>
    %171 = arith.addf %169, %170 : vector<8x128xf32>
    %172 = vector.broadcast %4 : vector<1x128xf32> to vector<8x128xf32>
    %173 = arith.addf %171, %172 : vector<8x128xf32>
    %174 = vector.extract_strided_slice %173 {offsets = [0, 0], sizes = [8, 32], strides = [1, 1]} : vector<8x128xf32> to vector<8x32xf32>
    %175 = arith.negf %174 : vector<8x32xf32>
    %176 = math.exp %175 : vector<8x32xf32>
    %cst_41 = arith.constant 1.000000e+00 : f32
    %177 = vector.broadcast %cst_41 : f32 to vector<8x32xf32>
    %178 = arith.addf %177, %176 : vector<8x32xf32>
    %179 = arith.divf %177, %178 : vector<8x32xf32>
    %180 = vector.extract_strided_slice %173 {offsets = [0, 32], sizes = [8, 32], strides = [1, 1]} : vector<8x128xf32> to vector<8x32xf32>
    %181 = arith.negf %180 : vector<8x32xf32>
    %182 = math.exp %181 : vector<8x32xf32>
    %cst_42 = arith.constant 1.000000e+00 : f32
    %183 = vector.broadcast %cst_42 : f32 to vector<8x32xf32>
    %184 = arith.addf %183, %182 : vector<8x32xf32>
    %185 = arith.divf %183, %184 : vector<8x32xf32>
    %186 = vector.extract_strided_slice %173 {offsets = [0, 64], sizes = [8, 32], strides = [1, 1]} : vector<8x128xf32> to vector<8x32xf32>
    %187 = math.tanh %186 : vector<8x32xf32>
    %188 = vector.extract_strided_slice %173 {offsets = [0, 96], sizes = [8, 32], strides = [1, 1]} : vector<8x128xf32> to vector<8x32xf32>
    %189 = arith.negf %188 : vector<8x32xf32>
    %190 = math.exp %189 : vector<8x32xf32>
    %cst_43 = arith.constant 1.000000e+00 : f32
    %191 = vector.broadcast %cst_43 : f32 to vector<8x32xf32>
    %192 = arith.addf %191, %190 : vector<8x32xf32>
    %193 = arith.divf %191, %192 : vector<8x32xf32>
    %194 = arith.mulf %185, %164 : vector<8x32xf32>
    %195 = arith.mulf %179, %187 : vector<8x32xf32>
    %196 = arith.addf %194, %195 : vector<8x32xf32>
    %197 = math.tanh %196 : vector<8x32xf32>
    %198 = arith.mulf %193, %197 : vector<8x32xf32>
    %c6_i32 = arith.constant 6 : i32
    %199 = arith.index_cast %c6_i32 : i32 to index
    %c0_44 = arith.constant 0 : index
    %c0_45 = arith.constant 0 : index
    %200 = vector.load %arg2[%199, %c0_44, %c0_45] : memref<8x8x128xf32, #tpu.memory_space<vmem>>, vector<1x8x128xf32>
    %201 = vector.shape_cast %200 : vector<1x8x128xf32> to vector<8x128xf32>
    %cst_46 = arith.constant dense<0.000000e+00> : vector<8x128xf32>
    %202 = tpu.matmul %198, %3, %cst_46 {dimension_numbers = #tpu.dot_dimension_numbers<[1], [0], [0], [1], [0, 0, 1, 1], [], []>} : vector<8x32xf32>, vector<32x128xf32>, vector<8x128xf32> -> vector<8x128xf32>
    %203 = arith.addf %201, %202 : vector<8x128xf32>
    %204 = vector.broadcast %4 : vector<1x128xf32> to vector<8x128xf32>
    %205 = arith.addf %203, %204 : vector<8x128xf32>
    %206 = vector.extract_strided_slice %205 {offsets = [0, 0], sizes = [8, 32], strides = [1, 1]} : vector<8x128xf32> to vector<8x32xf32>
    %207 = arith.negf %206 : vector<8x32xf32>
    %208 = math.exp %207 : vector<8x32xf32>
    %cst_47 = arith.constant 1.000000e+00 : f32
    %209 = vector.broadcast %cst_47 : f32 to vector<8x32xf32>
    %210 = arith.addf %209, %208 : vector<8x32xf32>
    %211 = arith.divf %209, %210 : vector<8x32xf32>
    %212 = vector.extract_strided_slice %205 {offsets = [0, 32], sizes = [8, 32], strides = [1, 1]} : vector<8x128xf32> to vector<8x32xf32>
    %213 = arith.negf %212 : vector<8x32xf32>
    %214 = math.exp %213 : vector<8x32xf32>
    %cst_48 = arith.constant 1.000000e+00 : f32
    %215 = vector.broadcast %cst_48 : f32 to vector<8x32xf32>
    %216 = arith.addf %215, %214 : vector<8x32xf32>
    %217 = arith.divf %215, %216 : vector<8x32xf32>
    %218 = vector.extract_strided_slice %205 {offsets = [0, 64], sizes = [8, 32], strides = [1, 1]} : vector<8x128xf32> to vector<8x32xf32>
    %219 = math.tanh %218 : vector<8x32xf32>
    %220 = vector.extract_strided_slice %205 {offsets = [0, 96], sizes = [8, 32], strides = [1, 1]} : vector<8x128xf32> to vector<8x32xf32>
    %221 = arith.negf %220 : vector<8x32xf32>
    %222 = math.exp %221 : vector<8x32xf32>
    %cst_49 = arith.constant 1.000000e+00 : f32
    %223 = vector.broadcast %cst_49 : f32 to vector<8x32xf32>
    %224 = arith.addf %223, %222 : vector<8x32xf32>
    %225 = arith.divf %223, %224 : vector<8x32xf32>
    %226 = arith.mulf %217, %196 : vector<8x32xf32>
    %227 = arith.mulf %211, %219 : vector<8x32xf32>
    %228 = arith.addf %226, %227 : vector<8x32xf32>
    %229 = math.tanh %228 : vector<8x32xf32>
    %230 = arith.mulf %225, %229 : vector<8x32xf32>
    %c7_i32 = arith.constant 7 : i32
    %231 = arith.index_cast %c7_i32 : i32 to index
    %c0_50 = arith.constant 0 : index
    %c0_51 = arith.constant 0 : index
    %232 = vector.load %arg2[%231, %c0_50, %c0_51] : memref<8x8x128xf32, #tpu.memory_space<vmem>>, vector<1x8x128xf32>
    %233 = vector.shape_cast %232 : vector<1x8x128xf32> to vector<8x128xf32>
    %cst_52 = arith.constant dense<0.000000e+00> : vector<8x128xf32>
    %234 = tpu.matmul %230, %3, %cst_52 {dimension_numbers = #tpu.dot_dimension_numbers<[1], [0], [0], [1], [0, 0, 1, 1], [], []>} : vector<8x32xf32>, vector<32x128xf32>, vector<8x128xf32> -> vector<8x128xf32>
    %235 = arith.addf %233, %234 : vector<8x128xf32>
    %236 = vector.broadcast %4 : vector<1x128xf32> to vector<8x128xf32>
    %237 = arith.addf %235, %236 : vector<8x128xf32>
    %238 = vector.extract_strided_slice %237 {offsets = [0, 0], sizes = [8, 32], strides = [1, 1]} : vector<8x128xf32> to vector<8x32xf32>
    %239 = arith.negf %238 : vector<8x32xf32>
    %240 = math.exp %239 : vector<8x32xf32>
    %cst_53 = arith.constant 1.000000e+00 : f32
    %241 = vector.broadcast %cst_53 : f32 to vector<8x32xf32>
    %242 = arith.addf %241, %240 : vector<8x32xf32>
    %243 = arith.divf %241, %242 : vector<8x32xf32>
    %244 = vector.extract_strided_slice %237 {offsets = [0, 32], sizes = [8, 32], strides = [1, 1]} : vector<8x128xf32> to vector<8x32xf32>
    %245 = arith.negf %244 : vector<8x32xf32>
    %246 = math.exp %245 : vector<8x32xf32>
    %cst_54 = arith.constant 1.000000e+00 : f32
    %247 = vector.broadcast %cst_54 : f32 to vector<8x32xf32>
    %248 = arith.addf %247, %246 : vector<8x32xf32>
    %249 = arith.divf %247, %248 : vector<8x32xf32>
    %250 = vector.extract_strided_slice %237 {offsets = [0, 64], sizes = [8, 32], strides = [1, 1]} : vector<8x128xf32> to vector<8x32xf32>
    %251 = math.tanh %250 : vector<8x32xf32>
    %252 = vector.extract_strided_slice %237 {offsets = [0, 96], sizes = [8, 32], strides = [1, 1]} : vector<8x128xf32> to vector<8x32xf32>
    %253 = arith.negf %252 : vector<8x32xf32>
    %254 = math.exp %253 : vector<8x32xf32>
    %cst_55 = arith.constant 1.000000e+00 : f32
    %255 = vector.broadcast %cst_55 : f32 to vector<8x32xf32>
    %256 = arith.addf %255, %254 : vector<8x32xf32>
    %257 = arith.divf %255, %256 : vector<8x32xf32>
    %258 = arith.mulf %249, %228 : vector<8x32xf32>
    %259 = arith.mulf %243, %251 : vector<8x32xf32>
    %260 = arith.addf %258, %259 : vector<8x32xf32>
    %261 = math.tanh %260 : vector<8x32xf32>
    %262 = arith.mulf %257, %261 : vector<8x32xf32>
    %c8_i32 = arith.constant 8 : i32
    %c0_56 = arith.constant 0 : index
    %c0_57 = arith.constant 0 : index
    %263 = vector.load %arg10[%c0_56, %c0_57] : memref<8x32xf32, #tpu.memory_space<vmem>>, vector<8x32xf32>
    tpu.vector_store %arg10[%c0_56, %c0_57], %262 {strides = array<i32>} : memref<8x32xf32, #tpu.memory_space<vmem>>, vector<8x32xf32>,
    %c0_58 = arith.constant 0 : index
    %c0_59 = arith.constant 0 : index
    %264 = vector.load %arg11[%c0_58, %c0_59] : memref<8x32xf32, #tpu.memory_space<vmem>>, vector<8x32xf32>
    tpu.vector_store %arg11[%c0_58, %c0_59], %260 {strides = array<i32>} : memref<8x32xf32, #tpu.memory_space<vmem>>, vector<8x32xf32>,
    %c0_i32_60 = arith.constant 0 : i32
    %265 = arith.cmpi eq, %arg1, %c0_i32_60 : i32
    %266 = arith.extui %265 : i1 to i32
    %c0_i32_61 = arith.constant 0 : i32
    %267 = arith.cmpi ne, %266, %c0_i32_61 : i32
    scf.if %267 {
      %c0_62 = arith.constant 0 : index
      %c0_63 = arith.constant 0 : index
      %268 = vector.load %arg3[%c0_62, %c0_63] : memref<8x128xf32, #tpu.memory_space<vmem>>, vector<8x128xf32>
      %c0_64 = arith.constant 0 : index
      %c0_65 = arith.constant 0 : index
      %269 = vector.load %arg6[%c0_64, %c0_65] : memref<1x128xf32, #tpu.memory_space<vmem>>, vector<1x128xf32>
      %270 = vector.broadcast %269 : vector<1x128xf32> to vector<8x128xf32>
      %271 = arith.addf %268, %270 : vector<8x128xf32>
      %272 = vector.extract_strided_slice %271 {offsets = [0, 0], sizes = [8, 32], strides = [1, 1]} : vector<8x128xf32> to vector<8x32xf32>
      %273 = arith.negf %272 : vector<8x32xf32>
      %274 = math.exp %273 : vector<8x32xf32>
      %cst_66 = arith.constant 1.000000e+00 : f32
      %275 = vector.broadcast %cst_66 : f32 to vector<8x32xf32>
      %276 = arith.addf %275, %274 : vector<8x32xf32>
      %277 = arith.divf %275, %276 : vector<8x32xf32>
      %278 = vector.extract_strided_slice %271 {offsets = [0, 64], sizes = [8, 32], strides = [1, 1]} : vector<8x128xf32> to vector<8x32xf32>
      %279 = math.tanh %278 : vector<8x32xf32>
      %280 = vector.extract_strided_slice %271 {offsets = [0, 96], sizes = [8, 32], strides = [1, 1]} : vector<8x128xf32> to vector<8x32xf32>
      %281 = arith.negf %280 : vector<8x32xf32>
      %282 = math.exp %281 : vector<8x32xf32>
      %cst_67 = arith.constant 1.000000e+00 : f32
      %283 = vector.broadcast %cst_67 : f32 to vector<8x32xf32>
      %284 = arith.addf %283, %282 : vector<8x32xf32>
      %285 = arith.divf %283, %284 : vector<8x32xf32>
      %286 = arith.mulf %277, %279 : vector<8x32xf32>
      %287 = math.tanh %286 : vector<8x32xf32>
      %288 = arith.mulf %285, %287 : vector<8x32xf32>
      %c0_68 = arith.constant 0 : index
      %c0_69 = arith.constant 0 : index
      %289 = vector.load %arg10[%c0_68, %c0_69] : memref<8x32xf32, #tpu.memory_space<vmem>>, vector<8x32xf32>
      %c0_70 = arith.constant 0 : index
      %c0_71 = arith.constant 0 : index
      %290 = vector.load %arg7[%c0_70, %c0_71] : memref<64x128xf32, #tpu.memory_space<vmem>>, vector<32x128xf32>
      %cst_72 = arith.constant dense<0.000000e+00> : vector<8x128xf32>
      %291 = tpu.matmul %289, %290, %cst_72 {dimension_numbers = #tpu.dot_dimension_numbers<[1], [0], [0], [1], [0, 0, 1, 1], [], []>} : vector<8x32xf32>, vector<32x128xf32>, vector<8x128xf32> -> vector<8x128xf32>
      %c32 = arith.constant 32 : index
      %c0_73 = arith.constant 0 : index
      %292 = vector.load %arg7[%c32, %c0_73] : memref<64x128xf32, #tpu.memory_space<vmem>>, vector<32x128xf32>
      %cst_74 = arith.constant dense<0.000000e+00> : vector<8x128xf32>
      %293 = tpu.matmul %288, %292, %cst_74 {dimension_numbers = #tpu.dot_dimension_numbers<[1], [0], [0], [1], [0, 0, 1, 1], [], []>} : vector<8x32xf32>, vector<32x128xf32>, vector<8x128xf32> -> vector<8x128xf32>
      %294 = arith.addf %291, %293 : vector<8x128xf32>
      %c0_75 = arith.constant 0 : index
      %c0_76 = arith.constant 0 : index
      %295 = vector.load %arg8[%c0_75, %c0_76] : memref<1x128xf32, #tpu.memory_space<vmem>>, vector<1x128xf32>
      %296 = vector.broadcast %295 : vector<1x128xf32> to vector<8x128xf32>
      %297 = arith.addf %294, %296 : vector<8x128xf32>
      %c0_77 = arith.constant 0 : index
      %c0_78 = arith.constant 0 : index
      %298 = vector.load %arg9[%c0_77, %c0_78] : memref<8x128xf32, #tpu.memory_space<vmem>>, vector<8x128xf32>
      tpu.vector_store %arg9[%c0_77, %c0_78], %297 {strides = array<i32>} : memref<8x128xf32, #tpu.memory_space<vmem>>, vector<8x128xf32>,
    } else {
    }
    return
  }
  func.func @transform_0(%arg0: i32, %arg1: i32) -> (i32, i32, i32) {
    %c0_i32 = arith.constant 0 : i32
    %c0_i32_0 = arith.constant 0 : i32
    return %arg1, %arg0, %c0_i32 : i32, i32, i32
  }
  func.func @transform_1(%arg0: i32, %arg1: i32) -> (i32, i32) {
    %c0_i32 = arith.constant 0 : i32
    %c0_i32_0 = arith.constant 0 : i32
    return %arg0, %c0_i32 : i32, i32
  }
  func.func @transform_2(%arg0: i32, %arg1: i32) -> (i32, i32) {
    %c0_i32 = arith.constant 0 : i32
    %c0_i32_0 = arith.constant 0 : i32
    %c0_i32_1 = arith.constant 0 : i32
    return %c0_i32, %c0_i32_0 : i32, i32
  }
  func.func @transform_3(%arg0: i32, %arg1: i32) -> (i32, i32) {
    %c0_i32 = arith.constant 0 : i32
    %c0_i32_0 = arith.constant 0 : i32
    %c0_i32_1 = arith.constant 0 : i32
    return %c0_i32, %c0_i32_0 : i32, i32
  }
  func.func @transform_4(%arg0: i32, %arg1: i32) -> (i32, i32) {
    %c0_i32 = arith.constant 0 : i32
    %c0_i32_0 = arith.constant 0 : i32
    %c0_i32_1 = arith.constant 0 : i32
    return %c0_i32, %c0_i32_0 : i32, i32
  }
  func.func @transform_5(%arg0: i32, %arg1: i32) -> (i32, i32) {
    %c0_i32 = arith.constant 0 : i32
    %c0_i32_0 = arith.constant 0 : i32
    %c0_i32_1 = arith.constant 0 : i32
    return %c0_i32, %c0_i32_0 : i32, i32
  }
  func.func @transform_6(%arg0: i32, %arg1: i32) -> (i32, i32) {
    %c0_i32 = arith.constant 0 : i32
    %c0_i32_0 = arith.constant 0 : i32
    %c0_i32_1 = arith.constant 0 : i32
    return %c0_i32, %c0_i32_0 : i32, i32
  }
  func.func @transform_7(%arg0: i32, %arg1: i32) -> (i32, i32) {
    %c0_i32 = arith.constant 0 : i32
    %c0_i32_0 = arith.constant 0 : i32
    return %arg0, %c0_i32 : i32, i32
  }
}

</mosaic_0001>

<bundles_post_ra>
// kernel: tpu_custom_call.1
= control target key start
LH: loop header
LB: loop body
LE: loop exit
PB: predicated region body
PF: predicated region fallthrough
CT: control target
= control target key end

     0   :  { %12 = vsyncpa [#allocation5], 0  ;;  %s1138_s0 = inlined_call_operand.hbm [shape: f32[8,8,128], index: 0, kind: input, shape index: {}]   ;;  %s1139_s1 = inlined_call_operand.hbm [shape: f32[8,128], index: 1, kind: input, shape index: {}]   ;;  %s1140_s2 = inlined_call_operand.hbm [shape: f32[32,128], index: 2, kind: input, shape index: {}]   ;;  %s1141_s3 = inlined_call_operand.vmem [shape: f32[1,128], index: 3, kind: input, shape index: {}]   ;;  %s1142_s4 = inlined_call_operand.vmem [shape: f32[1,128], index: 4, kind: input, shape index: {}]   ;;  %s1143_s5 = inlined_call_operand.hbm [shape: f32[64,128], index: 5, kind: input, shape index: {}]   ;;  %s1144_s6 = inlined_call_operand.vmem [shape: f32[1,128], index: 6, kind: input, shape index: {}]   ;;  %s1145_s7 = inlined_call_operand.hbm [shape: f32[8,128], index: 7, kind: output, shape index: {}]  }
   0x1   :  { %13 = vsyncpa [#allocation8], 0 }
   0x2   :  { %14 = vsyncpa [#allocation11], 0  ;;  %s34_s26 = sshll.u32 %s1139_s1, 4  ;;  %s35_s26 = int_to_ptr.hbm [resolvable:$true] %s34_s26 }
   0x3   :  { %15 = vsyncpa [#allocation6], 0  ;;  %s1000_s27 = smov [#allocation7]   ;;  %s20_s8 = sshll.u32 %s1138_s0, 4  ;;  %s21_s8 = int_to_ptr.hbm [resolvable:$true] %s20_s8 }
   0x4   :  { %s36_s28 = sshll.u32 %s1000_s27, 4  ;;  %s1001_s9 = smov [#allocation4]   ;;  %s37_s28 = int_to_ptr.vmem [resolvable:$true] %s36_s28 }
   0x5   :  { %39 = dma.hbm_to_vmem [thread:$0]  %s35_s26, 128, %s37_s28, [#allocation8]  }
   0x6   :  { %s22_s10 = sshll.u32 %s1001_s9, 4  ;;  %s1002_s11 = smov 128   ;;  %s23_s10 = int_to_ptr.vmem [resolvable:$true] %s22_s10 }
   0x7   :  { %s1003_s12 = smov 8   ;;  %s44_s1 = sshll.u32 %s1140_s2, 4  ;;  %s45_s1 = int_to_ptr.hbm [resolvable:$true] %s44_s1 }
   0x8   :  { %28 = dma.hbm_to_vmem [thread:$0]  %s21_s8, 1024, %s23_s10, [#allocation5], %s1002_s11, %s1002_s11, %s1003_s12  }
   0x9   :  { %s1004_s15 = smov [#allocation9]   ;;  %s61_s0 = sshll.u32 %s1143_s5, 4  ;;  %s62_s0 = int_to_ptr.hbm [resolvable:$true] %s61_s0 }
   0xa   :  { %s46_s16 = sshll.u32 %s1004_s15, 4  ;;  %s1005_s19 = smov [#allocation10]   ;;  %s47_s16 = int_to_ptr.vmem [resolvable:$true] %s46_s16 }
   0xb   :  { %52 = dma.hbm_to_vmem [thread:$0]  %s45_s1, 512, %s47_s16, [#allocation8], %s1002_s11, %s1002_s11, %s1003_s12  }
   0xc   :  { %s63_s20 = sshll.u32 %s1005_s19, 4  ;;  %s64_s20 = int_to_ptr.vmem [resolvable:$true] %s63_s20 }
   0xd   :  { %69 = dma.hbm_to_vmem [thread:$0]  %s62_s0, 1024, %s64_s20, [#allocation11], %s1002_s11, %s1002_s11, %s1003_s12  }
   0xe   :  { %992 = dma.done.wait [#allocation5], 1024  }
   0xf   :  { %993 = vsyncadd [#allocation5], 4294966272 }
  0x10   :  { %994 = dma.done.wait [#allocation8], 640  }
  0x11   :  { %995 = vsyncadd [#allocation8], 4294966656 }
  0x12   :  { %996 = dma.done.wait [#allocation11], 1024  }
  0x13   :  { %997 = vsyncadd [#allocation11], 4294966272  ;;  %vm92_vm0 = vcmask 261120   ;;  %v1006_v0 = vmov 0.0   ;;  %v98_v1 = vld [vmem:[#allocation9 + $0x18] sm:$0xff]  ;;  %v97_v2 = vld [vmem:[#allocation9 + $0x10] sm:$0xff] }
  0x14   :  { %93 = vst.msk [vmem:[#allocation2] sm:$0xff] %vm92_vm0, %v1006_v0  ;;  %119 = vmatpush.msra.mxu0 %v98_v1  ;;  %192 = vmatpush.msra.mxu1 %v98_v1  ;;  %v96_v3 = vld [vmem:[#allocation9 + $0x8] sm:$0xff]  ;;  %v95_v4 = vld [vmem:[#allocation9] sm:$0xff]  ;;  %v102_v6 = vld [vmem:[#allocation4] sm:$0xff]  ;;  %s1007_s21 = smov 64   ;;  %s1008_s22 = smov 32  }
  0x15   :  { %94 = vst.msk [vmem:[#allocation3] sm:$0xff] %vm92_vm0, %v1006_v0  ;;  %258 = vmatpush.msra.mxu2 %v98_v1  ;;  %324 = vmatpush.msra.mxu3 %v98_v1  ;;  %v1069_v7 = vld [vmem:[%s1141_s3] ss:$0 sm:$0xff]  ;;  %v174_v36 = vld [vmem:[#allocation4 + $0x8] sm:$0xff]  ;;  %s1010_s26 = smov [#allocation12]   ;;  %s755_s30 = sshll.u32 %s1145_s7, 4  ;;  %s756_s30 = int_to_ptr.hbm [resolvable:$true] %s755_s30 }
  0x16   :  { %120 = vmatpush.msra.mxu0 %v97_v2  ;;  %193 = vmatpush.msra.mxu1 %v97_v2  ;;  %v240_v63 = vld [vmem:[#allocation4 + $0x10] sm:$0xff]  ;;  %s753_s27 = sshll.u32 %s1010_s26, 4  ;;  %s754_s27 = int_to_ptr.vmem [resolvable:$true] %s753_s27 }
  0x17   :  { %259 = vmatpush.msra.mxu2 %v97_v2  ;;  %325 = vmatpush.msra.mxu3 %v97_v2 }
  0x18   :  { %121 = vmatpush.msra.mxu0 %v96_v3  ;;  %194 = vmatpush.msra.mxu1 %v96_v3 }
  0x19   :  { %260 = vmatpush.msra.mxu2 %v96_v3  ;;  %326 = vmatpush.msra.mxu3 %v96_v3 }
  0x1a   :  { %122 = vmatpush.msra.mxu0 %v95_v4  ;;  %195 = vmatpush.msra.mxu1 %v95_v4 }
  0x1b   :  { %v100_v5 = vld [vmem:[#allocation2] sm:$0xff]  ;;  %261 = vmatpush.msra.mxu2 %v95_v4  ;;  %327 = vmatpush.msra.mxu3 %v95_v4 }
  0x1c   :  { %767 = vmatmul.msk.f32.vlgmr.msra.gmra.mxu0 %vm92_vm0, %v100_v5  ;;  %456 = vmatpush.msrb.mxu1 %v98_v1  ;;  %v101_v12 = vld [vmem:[#allocation3] sm:$0xff] }
  0x1d   :  { %390 = vmatpush.msrb.mxu0 %v98_v1  ;;  %522 = vmatpush.msrb.mxu2 %v98_v1 }
  0x1e   :  { %588 = vmatpush.msrb.mxu3 %v98_v1  ;;  %457 = vmatpush.msrb.mxu1 %v97_v2 }
  0x1f   :  { %391 = vmatpush.msrb.mxu0 %v97_v2  ;;  %523 = vmatpush.msrb.mxu2 %v97_v2 }
  0x20   :  { %589 = vmatpush.msrb.mxu3 %v97_v2  ;;  %458 = vmatpush.msrb.mxu1 %v96_v3 }
  0x21   :  { %392 = vmatpush.msrb.mxu0 %v96_v3  ;;  %524 = vmatpush.msrb.mxu2 %v96_v3 }
  0x22   :  { %590 = vmatpush.msrb.mxu3 %v96_v3  ;;  %459 = vmatpush.msrb.mxu1 %v95_v4 }
  0x23   :  { %393 = vmatpush.msrb.mxu0 %v95_v4  ;;  %525 = vmatpush.msrb.mxu2 %v95_v4 }
  0x24   :  { %591 = vmatpush.msrb.mxu3 %v95_v4 }
  0x99   :  { %v124_v8 = vpop.f32.mrf.mxu0 }
  0x9a   :  { %v127_v9 = vadd.f32 %v124_v8, %v102_v6 }
  0x9c   :  { %v131_v10 = vadd.f32 %v1069_v7, %v127_v9 }
  0x9e   :  { %800 = vtanh.f32 %v131_v10  ;;  %v768_v13 = vmul.f32 -1.442695, %v131_v10 }
  0xa0   :  { %802 = vpow2.f32 %v768_v13 }
  0xa4   :  { %v801_v11 = vpop.eup %800 }
  0xa5   :  { %158 = vrot.lane.b32.xlu0 %v801_v11, %s1007_s21 }
  0xa6   :  { %v803_v14 = vpop.eup %802 }
  0xa7   :  { %v135_v15 = vadd.f32 1.0, %v803_v14 }
  0xa9   :  { %804 = vrcp.f32 %v135_v15  ;;  %v147_v21 = vand.u32 2147483648, %v135_v15  ;;  %vm141_vm2 = vweird.f32 %v135_v15  ;;  %v145_v22 = vand.u32 2147483647, %v135_v15 }
  0xab   :  { %v148_v24 = vor.u32 1.1754944e-38, %v147_v21  ;;  %vm146_vm4 = vcmp.eq.f32.partialorder %v145_v22, 8.507059e+37 }
  0xad   :  { %153 = vrot.lane.b32.xlu0 %v101_v12, %s1008_s22 }
  0xaf   :  { %v805_v16 = vpop.eup %804 }
  0xb0   :  { %v137_v17 = vmul.f32 %v805_v16, %v135_v15  ;;  %vm142_vm1 = vweird.f32 %v805_v16 }
  0xb1   :  { %vm143_vm3 = vmor %vm141_vm2, %vm142_vm1 }
  0xb2   :  { %v138_v18 = vsub.f32 1.0, %v137_v17 }
  0xb4   :  { %v139_v19 = vmul.f32 %v805_v16, %v138_v18 }
  0xb6   :  { %v140_v20 = vadd.f32 %v805_v16, %v139_v19 }
  0xb8   :  { %v144_v23 = vsel %vm143_vm3, %v805_v16, %v140_v20 }
  0xb9   :  { %v149_v26 = vsel %vm146_vm4, %v148_v24, %v144_v23 }
 0x117   :  { %v159_v25 = vpop.permute.xlu0 %158 }
 0x118   :  { %v161_v27 = vmul.f32 %v159_v25, %v149_v26 }
 0x11a   :  { %163 = vrot.lane.b32.xlu1 %v161_v27, %s1008_s22  ;;  %v306_v27 = vld [vmem:[#allocation4 + $0x18] sm:$0xff] }
 0x11f   :  { %v154_v28 = vpop.permute.xlu0 %153 }
 0x120   :  { %v156_v29 = vmul.f32 %v154_v28, %v149_v26 }
 0x18c   :  { %v164_v30 = vpop.permute.xlu1 %163 }
 0x18d   :  { %v166_v31 = vadd.f32 %v164_v30, %v156_v29 }
 0x18f   :  { %806 = vtanh.f32 %v166_v31 }
 0x195   :  { %v807_v32 = vpop.eup %806 }
 0x196   :  { %169 = vrot.lane.b32.xlu1 %v807_v32, %s1007_s21 }
 0x208   :  { %v170_v33 = vpop.permute.xlu1 %169 }
 0x209   :  { %v172_v34 = vmul.f32 %v170_v33, %v149_v26 }
 0x20b   :  { %176 = vrot.lane.b32.xlu2 %v172_v34, %s1008_s22 }
 0x265   :  { %v177_v35 = vpop.permute.xlu2 %176 }
 0x266   :  { %769 = vmatmul.msk.f32.vlgmr.msra.gmra.mxu1 %vm92_vm0, %v177_v35 }
 0x2e3   :  { %v197_v37 = vpop.f32.mrf.mxu1 }
 0x2e4   :  { %v200_v38 = vadd.f32 %v197_v37, %v174_v36 }
 0x2e6   :  { %v201_v39 = vadd.f32 %v1069_v7, %v200_v38 }
 0x2e8   :  { %808 = vtanh.f32 %v201_v39  ;;  %v770_v41 = vmul.f32 -1.442695, %v201_v39 }
 0x2ea   :  { %810 = vpow2.f32 %v770_v41 }
 0x2ee   :  { %v809_v40 = vpop.eup %808 }
 0x2ef   :  { %224 = vrot.lane.b32.xlu2 %v809_v40, %s1007_s21 }
 0x2f0   :  { %v811_v42 = vpop.eup %810 }
 0x2f1   :  { %v205_v43 = vadd.f32 1.0, %v811_v42 }
 0x2f3   :  { %812 = vrcp.f32 %v205_v43  ;;  %v217_v49 = vand.u32 2147483648, %v205_v43  ;;  %vm211_vm6 = vweird.f32 %v205_v43  ;;  %v215_v50 = vand.u32 2147483647, %v205_v43 }
 0x2f5   :  { %v218_v52 = vor.u32 1.1754944e-38, %v217_v49  ;;  %vm216_vm8 = vcmp.eq.f32.partialorder %v215_v50, 8.507059e+37 }
 0x2f9   :  { %v813_v44 = vpop.eup %812 }
 0x2fa   :  { %v207_v45 = vmul.f32 %v813_v44, %v205_v43  ;;  %vm212_vm5 = vweird.f32 %v813_v44 }
 0x2fb   :  { %vm213_vm7 = vmor %vm211_vm6, %vm212_vm5 }
 0x2fc   :  { %v208_v46 = vsub.f32 1.0, %v207_v45 }
 0x2fe   :  { %v209_v47 = vmul.f32 %v813_v44, %v208_v46 }
 0x300   :  { %v210_v48 = vadd.f32 %v813_v44, %v209_v47 }
 0x302   :  { %v214_v51 = vsel %vm213_vm7, %v813_v44, %v210_v48 }
 0x303   :  { %v219_v54 = vsel %vm216_vm8, %v218_v52, %v214_v51 }
 0x304   :  { %v222_v56 = vmul.f32 %v219_v54, %v166_v31 }
 0x349   :  { %v225_v53 = vpop.permute.xlu2 %224 }
 0x34a   :  { %v227_v55 = vmul.f32 %v225_v53, %v219_v54 }
 0x34c   :  { %229 = vrot.lane.b32.xlu0 %v227_v55, %s1008_s22 }
 0x3be   :  { %v230_v57 = vpop.permute.xlu0 %229 }
 0x3bf   :  { %v232_v58 = vadd.f32 %v230_v57, %v222_v56 }
 0x3c1   :  { %814 = vtanh.f32 %v232_v58 }
 0x3c7   :  { %v815_v59 = vpop.eup %814 }
 0x3c8   :  { %235 = vrot.lane.b32.xlu1 %v815_v59, %s1007_s21 }
 0x43a   :  { %v236_v60 = vpop.permute.xlu1 %235 }
 0x43b   :  { %v238_v61 = vmul.f32 %v236_v60, %v219_v54  ;;  %v372_v54 = vld [vmem:[#allocation4 + $0x20] sm:$0xff] }
 0x43d   :  { %242 = vrot.lane.b32.xlu2 %v238_v61, %s1008_s22 }
 0x497   :  { %v243_v62 = vpop.permute.xlu2 %242 }
 0x498   :  { %771 = vmatmul.msk.f32.vlgmr.msra.gmra.mxu2 %vm92_vm0, %v243_v62 }
 0x51b   :  { %v263_v0 = vpop.f32.mrf.mxu2 }
 0x51c   :  { %v266_v1 = vadd.f32 %v263_v0, %v240_v63 }
 0x51e   :  { %v267_v2 = vadd.f32 %v1069_v7, %v266_v1 }
 0x520   :  { %816 = vtanh.f32 %v267_v2  ;;  %v772_v4 = vmul.f32 -1.442695, %v267_v2 }
 0x522   :  { %818 = vpow2.f32 %v772_v4 }
 0x526   :  { %v817_v3 = vpop.eup %816 }
 0x527   :  { %290 = vrot.lane.b32.xlu0 %v817_v3, %s1007_s21 }
 0x528   :  { %v819_v5 = vpop.eup %818 }
 0x529   :  { %v271_v6 = vadd.f32 1.0, %v819_v5 }
 0x52b   :  { %820 = vrcp.f32 %v271_v6  ;;  %v283_v13 = vand.u32 2147483648, %v271_v6  ;;  %vm277_vm10 = vweird.f32 %v271_v6  ;;  %v281_v14 = vand.u32 2147483647, %v271_v6 }
 0x52d   :  { %v284_v16 = vor.u32 1.1754944e-38, %v283_v13  ;;  %vm282_vm12 = vcmp.eq.f32.partialorder %v281_v14, 8.507059e+37 }
 0x531   :  { %v821_v8 = vpop.eup %820 }
 0x532   :  { %v273_v9 = vmul.f32 %v821_v8, %v271_v6  ;;  %vm278_vm9 = vweird.f32 %v821_v8 }
 0x533   :  { %vm279_vm11 = vmor %vm277_vm10, %vm278_vm9 }
 0x534   :  { %v274_v10 = vsub.f32 1.0, %v273_v9 }
 0x536   :  { %v275_v11 = vmul.f32 %v821_v8, %v274_v10 }
 0x538   :  { %v276_v12 = vadd.f32 %v821_v8, %v275_v11 }
 0x53a   :  { %v280_v15 = vsel %vm279_vm11, %v821_v8, %v276_v12 }
 0x53b   :  { %v285_v18 = vsel %vm282_vm12, %v284_v16, %v280_v15 }
 0x53c   :  { %v288_v20 = vmul.f32 %v285_v18, %v232_v58 }
 0x599   :  { %v291_v17 = vpop.permute.xlu0 %290 }
 0x59a   :  { %v293_v19 = vmul.f32 %v291_v17, %v285_v18 }
 0x59c   :  { %295 = vrot.lane.b32.xlu1 %v293_v19, %s1008_s22 }
 0x60e   :  { %v296_v21 = vpop.permute.xlu1 %295 }
 0x60f   :  { %v298_v22 = vadd.f32 %v296_v21, %v288_v20 }
 0x611   :  { %822 = vtanh.f32 %v298_v22 }
 0x617   :  { %v823_v23 = vpop.eup %822 }
 0x618   :  { %301 = vrot.lane.b32.xlu2 %v823_v23, %s1007_s21 }
 0x672   :  { %v302_v24 = vpop.permute.xlu2 %301 }
 0x673   :  { %v304_v25 = vmul.f32 %v302_v24, %v285_v18  ;;  %v438_v18 = vld [vmem:[#allocation4 + $0x28] sm:$0xff] }
 0x675   :  { %308 = vrot.lane.b32.xlu0 %v304_v25, %s1008_s22 }
 0x6e7   :  { %v309_v26 = vpop.permute.xlu0 %308 }
 0x6e8   :  { %773 = vmatmul.msk.f32.vlgmr.msra.gmra.mxu3 %vm92_vm0, %v309_v26 }
 0x76b   :  { %v329_v28 = vpop.f32.mrf.mxu3 }
 0x76c   :  { %v332_v29 = vadd.f32 %v329_v28, %v306_v27 }
 0x76e   :  { %v333_v30 = vadd.f32 %v1069_v7, %v332_v29 }
 0x770   :  { %824 = vtanh.f32 %v333_v30  ;;  %v774_v32 = vmul.f32 -1.442695, %v333_v30 }
 0x772   :  { %826 = vpow2.f32 %v774_v32 }
 0x776   :  { %v825_v31 = vpop.eup %824 }
 0x777   :  { %356 = vrot.lane.b32.xlu1 %v825_v31, %s1007_s21 }
 0x778   :  { %v827_v33 = vpop.eup %826 }
 0x779   :  { %v337_v34 = vadd.f32 1.0, %v827_v33 }
 0x77b   :  { %828 = vrcp.f32 %v337_v34  ;;  %v349_v40 = vand.u32 2147483648, %v337_v34  ;;  %vm343_vm14 = vweird.f32 %v337_v34  ;;  %v347_v41 = vand.u32 2147483647, %v337_v34 }
 0x77d   :  { %v350_v43 = vor.u32 1.1754944e-38, %v349_v40  ;;  %vm348_vm1 = vcmp.eq.f32.partialorder %v347_v41, 8.507059e+37 }
 0x781   :  { %v829_v35 = vpop.eup %828 }
 0x782   :  { %v339_v36 = vmul.f32 %v829_v35, %v337_v34  ;;  %vm344_vm13 = vweird.f32 %v829_v35 }
 0x783   :  { %vm345_vm15 = vmor %vm343_vm14, %vm344_vm13 }
 0x784   :  { %v340_v37 = vsub.f32 1.0, %v339_v36 }
 0x786   :  { %v341_v38 = vmul.f32 %v829_v35, %v340_v37 }
 0x788   :  { %v342_v39 = vadd.f32 %v829_v35, %v341_v38 }
 0x78a   :  { %v346_v42 = vsel %vm345_vm15, %v829_v35, %v342_v39 }
 0x78b   :  { %v351_v45 = vsel %vm348_vm1, %v350_v43, %v346_v42 }
 0x78c   :  { %v354_v47 = vmul.f32 %v351_v45, %v298_v22 }
 0x7e9   :  { %v357_v44 = vpop.permute.xlu1 %356 }
 0x7ea   :  { %v359_v46 = vmul.f32 %v357_v44, %v351_v45 }
 0x7ec   :  { %361 = vrot.lane.b32.xlu2 %v359_v46, %s1008_s22 }
 0x846   :  { %v362_v48 = vpop.permute.xlu2 %361 }
 0x847   :  { %v364_v49 = vadd.f32 %v362_v48, %v354_v47 }
 0x849   :  { %830 = vtanh.f32 %v364_v49 }
 0x84f   :  { %v831_v50 = vpop.eup %830 }
 0x850   :  { %367 = vrot.lane.b32.xlu0 %v831_v50, %s1007_s21 }
 0x8c2   :  { %v368_v51 = vpop.permute.xlu0 %367 }
 0x8c3   :  { %v370_v52 = vmul.f32 %v368_v51, %v351_v45  ;;  %v504_v45 = vld [vmem:[#allocation4 + $0x30] sm:$0xff] }
 0x8c5   :  { %374 = vrot.lane.b32.xlu1 %v370_v52, %s1008_s22 }
 0x937   :  { %v375_v53 = vpop.permute.xlu1 %374 }
 0x938   :  { %775 = vmatmul.msk.f32.vlgmr.msrb.gmra.mxu0 %vm92_vm0, %v375_v53 }
 0x9b5   :  { %v395_v55 = vpop.f32.mrf.mxu0 }
 0x9b6   :  { %v398_v56 = vadd.f32 %v395_v55, %v372_v54 }
 0x9b8   :  { %v399_v57 = vadd.f32 %v1069_v7, %v398_v56 }
 0x9ba   :  { %832 = vtanh.f32 %v399_v57  ;;  %v776_v59 = vmul.f32 -1.442695, %v399_v57 }
 0x9bc   :  { %834 = vpow2.f32 %v776_v59 }
 0x9c0   :  { %v833_v58 = vpop.eup %832 }
 0x9c1   :  { %422 = vrot.lane.b32.xlu2 %v833_v58, %s1007_s21 }
 0x9c2   :  { %v835_v60 = vpop.eup %834 }
 0x9c3   :  { %v403_v61 = vadd.f32 1.0, %v835_v60 }
 0x9c5   :  { %836 = vrcp.f32 %v403_v61  ;;  %v415_v3 = vand.u32 2147483648, %v403_v61  ;;  %vm409_vm3 = vweird.f32 %v403_v61  ;;  %v413_v4 = vand.u32 2147483647, %v403_v61 }
 0x9c7   :  { %v416_v6 = vor.u32 1.1754944e-38, %v415_v3  ;;  %vm414_vm5 = vcmp.eq.f32.partialorder %v413_v4, 8.507059e+37 }
 0x9cb   :  { %v837_v62 = vpop.eup %836 }
 0x9cc   :  { %v405_v63 = vmul.f32 %v837_v62, %v403_v61  ;;  %vm410_vm2 = vweird.f32 %v837_v62 }
 0x9cd   :  { %vm411_vm4 = vmor %vm409_vm3, %vm410_vm2 }
 0x9ce   :  { %v406_v0 = vsub.f32 1.0, %v405_v63 }
 0x9d0   :  { %v407_v1 = vmul.f32 %v837_v62, %v406_v0 }
 0x9d2   :  { %v408_v2 = vadd.f32 %v837_v62, %v407_v1 }
 0x9d4   :  { %v412_v5 = vsel %vm411_vm4, %v837_v62, %v408_v2 }
 0x9d5   :  { %v417_v9 = vsel %vm414_vm5, %v416_v6, %v412_v5 }
 0x9d6   :  { %v420_v11 = vmul.f32 %v417_v9, %v364_v49 }
 0xa1b   :  { %v423_v8 = vpop.permute.xlu2 %422 }
 0xa1c   :  { %v425_v10 = vmul.f32 %v423_v8, %v417_v9 }
 0xa1e   :  { %427 = vrot.lane.b32.xlu0 %v425_v10, %s1008_s22  ;;  %v798_v10 = vld [vmem:[%s1142_s4] ss:$0 sm:$0xff]  ;;  %s1009_s4 = smov 96  }
 0xa90   :  { %v428_v12 = vpop.permute.xlu0 %427 }
 0xa91   :  { %v430_v13 = vadd.f32 %v428_v12, %v420_v11 }
 0xa93   :  { %838 = vtanh.f32 %v430_v13 }
 0xa99   :  { %v839_v14 = vpop.eup %838 }
 0xa9a   :  { %433 = vrot.lane.b32.xlu1 %v839_v14, %s1007_s21 }
 0xb0c   :  { %v434_v15 = vpop.permute.xlu1 %433 }
 0xb0d   :  { %v436_v16 = vmul.f32 %v434_v15, %v417_v9  ;;  %v648_v9 = vld [vmem:[#allocation7] sm:$0xff] }
 0xb0e   :  { %v653_v11 = vadd.f32 %v798_v10, %v648_v9 }
 0xb0f   :  { %440 = vrot.lane.b32.xlu2 %v436_v16, %s1008_s22 }
 0xb69   :  { %v441_v17 = vpop.permute.xlu2 %440 }
 0xb6a   :  { %777 = vmatmul.msk.f32.vlgmr.msrb.gmra.mxu1 %vm92_vm0, %v441_v17 }
 0xbe7   :  { %v461_v19 = vpop.f32.mrf.mxu1 }
 0xbe8   :  { %v464_v20 = vadd.f32 %v461_v19, %v438_v18 }
 0xbea   :  { %v465_v21 = vadd.f32 %v1069_v7, %v464_v20 }
 0xbec   :  { %840 = vtanh.f32 %v465_v21  ;;  %v778_v23 = vmul.f32 -1.442695, %v465_v21  ;;  %v783_v21 = vmul.f32 -1.442695, %v653_v11 }
 0xbee   :  { %842 = vpow2.f32 %v778_v23 }
 0xbf2   :  { %v841_v22 = vpop.eup %840 }
 0xbf3   :  { %488 = vrot.lane.b32.xlu0 %v841_v22, %s1007_s21 }
 0xbf4   :  { %v843_v24 = vpop.eup %842 }
 0xbf5   :  { %v469_v25 = vadd.f32 1.0, %v843_v24 }
 0xbf7   :  { %844 = vrcp.f32 %v469_v25  ;;  %v481_v31 = vand.u32 2147483648, %v469_v25  ;;  %vm475_vm7 = vweird.f32 %v469_v25  ;;  %v479_v32 = vand.u32 2147483647, %v469_v25 }
 0xbf9   :  { %v482_v34 = vor.u32 1.1754944e-38, %v481_v31  ;;  %vm480_vm9 = vcmp.eq.f32.partialorder %v479_v32, 8.507059e+37 }
 0xbfd   :  { %v845_v26 = vpop.eup %844 }
 0xbfe   :  { %v471_v27 = vmul.f32 %v845_v26, %v469_v25  ;;  %vm476_vm6 = vweird.f32 %v845_v26 }
 0xbff   :  { %vm477_vm8 = vmor %vm475_vm7, %vm476_vm6 }
 0xc00   :  { %v472_v28 = vsub.f32 1.0, %v471_v27 }
 0xc02   :  { %v473_v29 = vmul.f32 %v845_v26, %v472_v28 }
 0xc04   :  { %v474_v30 = vadd.f32 %v845_v26, %v473_v29 }
 0xc06   :  { %v478_v33 = vsel %vm477_vm8, %v845_v26, %v474_v30 }
 0xc07   :  { %v483_v36 = vsel %vm480_vm9, %v482_v34, %v478_v33 }
 0xc08   :  { %v486_v38 = vmul.f32 %v483_v36, %v430_v13  ;;  %v570_v13 = vld [vmem:[#allocation4 + $0x38] sm:$0xff] }
 0xc65   :  { %v489_v35 = vpop.permute.xlu0 %488 }
 0xc66   :  { %v491_v37 = vmul.f32 %v489_v35, %v483_v36 }
 0xc68   :  { %493 = vrot.lane.b32.xlu1 %v491_v37, %s1008_s22 }
 0xcda   :  { %v494_v39 = vpop.permute.xlu1 %493 }
 0xcdb   :  { %v496_v40 = vadd.f32 %v494_v39, %v486_v38 }
 0xcdd   :  { %846 = vtanh.f32 %v496_v40 }
 0xce3   :  { %v847_v41 = vpop.eup %846 }
 0xce4   :  { %499 = vrot.lane.b32.xlu2 %v847_v41, %s1007_s21 }
 0xd3e   :  { %v500_v42 = vpop.permute.xlu2 %499 }
 0xd3f   :  { %v502_v43 = vmul.f32 %v500_v42, %v483_v36 }
 0xd41   :  { %506 = vrot.lane.b32.xlu0 %v502_v43, %s1008_s22 }
 0xdb3   :  { %v507_v44 = vpop.permute.xlu0 %506 }
 0xdb4   :  { %779 = vmatmul.msk.f32.vlgmr.msrb.gmra.mxu2 %vm92_vm0, %v507_v44 }
 0xe37   :  { %v527_v46 = vpop.f32.mrf.mxu2 }
 0xe38   :  { %v530_v47 = vadd.f32 %v527_v46, %v504_v45 }
 0xe3a   :  { %v531_v48 = vadd.f32 %v1069_v7, %v530_v47 }
 0xe3c   :  { %848 = vtanh.f32 %v531_v48  ;;  %v780_v50 = vmul.f32 -1.442695, %v531_v48 }
 0xe3e   :  { %850 = vpow2.f32 %v780_v50 }
 0xe42   :  { %v849_v49 = vpop.eup %848 }
 0xe43   :  { %554 = vrot.lane.b32.xlu1 %v849_v49, %s1007_s21 }
 0xe44   :  { %v851_v51 = vpop.eup %850 }
 0xe45   :  { %v535_v52 = vadd.f32 1.0, %v851_v51 }
 0xe47   :  { %852 = vrcp.f32 %v535_v52  ;;  %v547_v58 = vand.u32 2147483648, %v535_v52  ;;  %vm541_vm11 = vweird.f32 %v535_v52  ;;  %v545_v59 = vand.u32 2147483647, %v535_v52 }
 0xe49   :  { %v548_v61 = vor.u32 1.1754944e-38, %v547_v58  ;;  %vm546_vm13 = vcmp.eq.f32.partialorder %v545_v59, 8.507059e+37  ;;  %v689_v58 = vld [vmem:[#allocation10 + $0x18] sm:$0xff]  ;;  %v692_v59 = vld [vmem:[#allocation10 + $0x30] sm:$0xff] }
 0xe4a   :  { %734 = vmatpush.msra.mxu1 %v689_v58 }
 0xe4d   :  { %v853_v53 = vpop.eup %852 }
 0xe4e   :  { %v537_v54 = vmul.f32 %v853_v53, %v535_v52  ;;  %vm542_vm10 = vweird.f32 %v853_v53 }
 0xe4f   :  { %vm543_vm12 = vmor %vm541_vm11, %vm542_vm10 }
 0xe50   :  { %v538_v55 = vsub.f32 1.0, %v537_v54 }
 0xe52   :  { %v539_v56 = vmul.f32 %v853_v53, %v538_v55 }
 0xe54   :  { %v540_v57 = vadd.f32 %v853_v53, %v539_v56 }
 0xe56   :  { %v544_v60 = vsel %vm543_vm12, %v853_v53, %v540_v57  ;;  %v693_v57 = vld [vmem:[#allocation10 + $0x38] sm:$0xff] }
 0xe57   :  { %v549_v63 = vsel %vm546_vm13, %v548_v61, %v544_v60  ;;  %711 = vmatpush.msra.mxu0 %v693_v57  ;;  %v688_v60 = vld [vmem:[#allocation10 + $0x10] sm:$0xff]  ;;  %v691_v61 = vld [vmem:[#allocation10 + $0x28] sm:$0xff] }
 0xe58   :  { %v552_v1 = vmul.f32 %v549_v63, %v496_v40  ;;  %735 = vmatpush.msra.mxu1 %v688_v60 }
 0xe59   :  { %712 = vmatpush.msra.mxu0 %v692_v59 }
 0xe5b   :  { %713 = vmatpush.msra.mxu0 %v691_v61 }
 0xeb5   :  { %v555_v62 = vpop.permute.xlu1 %554 }
 0xeb6   :  { %v557_v0 = vmul.f32 %v555_v62, %v549_v63  ;;  %v687_v62 = vld [vmem:[#allocation10 + $0x8] sm:$0xff] }
 0xeb7   :  { %736 = vmatpush.msra.mxu1 %v687_v62 }
 0xeb8   :  { %559 = vrot.lane.b32.xlu2 %v557_v0, %s1008_s22  ;;  %v686_v0 = vld [vmem:[#allocation10] sm:$0xff] }
 0xeb9   :  { %737 = vmatpush.msra.mxu1 %v686_v0 }
 0xf12   :  { %v560_v2 = vpop.permute.xlu2 %559 }
 0xf13   :  { %v1111_v3 = vadd.f32 %v560_v2, %v552_v1 }
 0xf15   :  { %854 = vtanh.f32 %v1111_v3 }
 0xf16   :  { %856 = vtanh.f32 %v653_v11 }
 0xf1b   :  { %v855_v4 = vpop.eup %854 }
 0xf1c   :  { %565 = vrot.lane.b32.xlu0 %v855_v4, %s1007_s21  ;;  %v857_v12 = vpop.eup %856 }
 0xf8e   :  { %v566_v5 = vpop.permute.xlu0 %565 }
 0xf8f   :  { %v568_v6 = vmul.f32 %v566_v5, %v549_v63  ;;  %v690_v63 = vld [vmem:[#allocation10 + $0x20] sm:$0xff]  ;;  %v799_v5 = vld [vmem:[%s1144_s6] ss:$0 sm:$0xff] }
 0xf90   :  { %714 = vmatpush.msra.mxu0 %v690_v63 }
 0xf91   :  { %572 = vrot.lane.b32.xlu1 %v568_v6, %s1008_s22 }
 0xf99   :  { %675 = vrot.lane.b32.xlu1 %v857_v12, %s1007_s21 }
0x1003   :  { %v573_v8 = vpop.permute.xlu1 %572 }
0x1004   :  { %781 = vmatmul.msk.f32.vlgmr.msrb.gmra.mxu3 %vm92_vm0, %v573_v8 }
0x100b   :  { %v676_v45 = vpop.permute.xlu1 %675 }
0x1087   :  { %v593_v14 = vpop.f32.mrf.mxu3 }
0x1088   :  { %v596_v15 = vadd.f32 %v593_v14, %v570_v13 }
0x108a   :  { %v597_v16 = vadd.f32 %v1069_v7, %v596_v15 }
0x108c   :  { %858 = vtanh.f32 %v597_v16  ;;  %v782_v18 = vmul.f32 -1.442695, %v597_v16 }
0x108e   :  { %860 = vpow2.f32 %v782_v18 }
0x1092   :  { %v859_v17 = vpop.eup %858 }
0x1093   :  { %620 = vrot.lane.b32.xlu2 %v859_v17, %s1007_s21 }
0x1094   :  { %v861_v19 = vpop.eup %860 }
0x1095   :  { %v601_v20 = vadd.f32 1.0, %v861_v19 }
0x1097   :  { %862 = vrcp.f32 %v601_v20  ;;  %v613_v31 = vand.u32 2147483648, %v601_v20  ;;  %vm607_vm15 = vweird.f32 %v601_v20  ;;  %v611_v33 = vand.u32 2147483647, %v601_v20 }
0x1098   :  { %864 = vpow2.f32 %v783_v21 }
0x1099   :  { %v614_v36 = vor.u32 1.1754944e-38, %v613_v31  ;;  %vm612_vm4 = vcmp.eq.f32.partialorder %v611_v33, 8.507059e+37 }
0x109d   :  { %v863_v22 = vpop.eup %862 }
0x109e   :  { %v865_v23 = vpop.eup %864  ;;  %v603_v25 = vmul.f32 %v863_v22, %v601_v20  ;;  %vm608_vm14 = vweird.f32 %v863_v22 }
0x109f   :  { %v657_v24 = vadd.f32 1.0, %v865_v23  ;;  %vm609_vm1 = vmor %vm607_vm15, %vm608_vm14 }
0x10a0   :  { %v604_v26 = vsub.f32 1.0, %v603_v25 }
0x10a1   :  { %866 = vrcp.f32 %v657_v24  ;;  %vm663_vm2 = vweird.f32 %v657_v24  ;;  %v669_v35 = vand.u32 2147483648, %v657_v24  ;;  %v667_v38 = vand.u32 2147483647, %v657_v24 }
0x10a2   :  { %v605_v28 = vmul.f32 %v863_v22, %v604_v26 }
0x10a3   :  { %v670_v42 = vor.u32 1.1754944e-38, %v669_v35  ;;  %vm668_vm6 = vcmp.eq.f32.partialorder %v667_v38, 8.507059e+37 }
0x10a4   :  { %v606_v30 = vadd.f32 %v863_v22, %v605_v28 }
0x10a6   :  { %v610_v34 = vsel %vm609_vm1, %v863_v22, %v606_v30 }
0x10a7   :  { %v867_v27 = vpop.eup %866  ;;  %v615_v40 = vsel %vm612_vm4, %v614_v36, %v610_v34 }
0x10a8   :  { %v659_v7 = vmul.f32 %v867_v27, %v657_v24  ;;  %vm664_vm3 = vweird.f32 %v867_v27  ;;  %v618_v48 = vmul.f32 %v615_v40, %v1111_v3 }
0x10a9   :  { %vm665_vm5 = vmor %vm663_vm2, %vm664_vm3 }
0x10aa   :  { %v660_v29 = vsub.f32 1.0, %v659_v7 }
0x10ac   :  { %v661_v32 = vmul.f32 %v867_v27, %v660_v29 }
0x10ae   :  { %v662_v37 = vadd.f32 %v867_v27, %v661_v32 }
0x10b0   :  { %v666_v43 = vsel %vm665_vm5, %v867_v27, %v662_v37 }
0x10b1   :  { %v671_v44 = vsel %vm668_vm6, %v670_v42, %v666_v43 }
0x10b2   :  { %v678_v46 = vmul.f32 %v676_v45, %v671_v44 }
0x10b4   :  { %868 = vtanh.f32 %v678_v46 }
0x10ba   :  { %v869_v47 = vpop.eup %868 }
0x10ed   :  { %v621_v39 = vpop.permute.xlu2 %620 }
0x10ee   :  { %v623_v41 = vmul.f32 %v621_v39, %v615_v40 }
0x10f0   :  { %625 = vrot.lane.b32.xlu0 %v623_v41, %s1008_s22 }
0x10f8   :  { %681 = vrot.lane.b32.xlu0 %v869_v47, %s1009_s4 }
0x1162   :  { %v626_v49 = vpop.permute.xlu0 %625 }
0x1163   :  { %v628_v50 = vadd.f32 %v626_v49, %v618_v48 }
0x1165   :  { %870 = vtanh.f32 %v628_v50  ;;  %641 = vrot.lane.b32.xlu0 %v628_v50, %s1009_s4 }
0x116a   :  { %v682_v52 = vpop.permute.xlu0 %681 }
0x116b   :  { %v871_v51 = vpop.eup %870  ;;  %v684_v53 = vmul.f32 %v682_v52, %v671_v44 }
0x116c   :  { %631 = vrot.lane.b32.xlu2 %v871_v51, %s1007_s21 }
0x1174   :  { %695 = vrot.lane.b32.xlu2 %v684_v53, %s1008_s22 }
0x11c6   :  { %v632_v54 = vpop.permute.xlu2 %631 }
0x11c7   :  { %v634_v55 = vmul.f32 %v632_v54, %v615_v40 }
0x11c9   :  { %636 = vrot.lane.b32.xlu1 %v634_v55, %s1008_s22 }
0x11ce   :  { %v696_v1 = vpop.permute.xlu2 %695 }
0x11cf   :  { %784 = vmatmul.msk.f32.vlgmr.msra.gmra.mxu0 %vm92_vm0, %v696_v1 }
0x11d7   :  { %v642_v56 = vpop.permute.xlu0 %641 }
0x11d8   :  { %644 = vst.msk [vmem:[#allocation3] sm:$0xff] %vm92_vm0, %v642_v56 }
0x123b   :  { %v637_v2 = vpop.permute.xlu1 %636 }
0x123c   :  { %639 = vst.msk [vmem:[#allocation2] sm:$0xff] %vm92_vm0, %v637_v2 }
0x1243   :  { %v685_v3 = vld [vmem:[#allocation2] sm:$0xff] }
0x1244   :  { %785 = vmatmul.msk.f32.vlgmr.msra.gmra.mxu1 %vm92_vm0, %v685_v3 }
0x124c   :  { %v716_v4 = vpop.f32.mrf.mxu0 }
0x12c1   :  { %v739_v6 = vpop.f32.mrf.mxu1 }
0x12c2   :  { %v740_v8 = vadd.f32 %v739_v6, %v716_v4 }
0x12c4   :  { %v746_v9 = vadd.f32 %v799_v5, %v740_v8 }
0x12c6   :  { %747 = vst [vmem:[#allocation12] sm:$0xff] %v746_v9 }
0x12c7   :  { %758 = dma.vmem_to_hbm [thread:$0]  %s754_s27, 128, %s756_s30, [#allocation6]  }
0x12c8   :  { %998 = dma.done.wait [#allocation6], 128  }
0x12c9   :  { %999 = vsyncadd [#allocation6], 4294967168 }
0x12ca   :  { %763 = vsyncpa [#allocation5], 1 }
0x12cb   :  { %764 = vsyncpa [#allocation8], 1 }
0x12cc   :  { %765 = vsyncpa [#allocation11], 1 }
0x12cd   :  { %766 = vsyncpa [#allocation6], 1 }

</bundles_post_ra>
